<compile_context>
chip_gen: v5e
topology: v5e:2x2
jax: 0.10.0
libtpu: 0.0.40
codegen_flags: <defaults>
</compile_context>

<pallas_src>
import functools

import jax
import jax.numpy as jnp
from jax.experimental import pallas as pl
from jax.experimental.pallas import tpu as pltpu


def _round_up(x, m):
    return ((x + m - 1) // m) * m


def _mlp_kernel(x_ref, w1_ref, b1_ref, w2_ref, b2_ref, o_ref, *, compute_dtype):
    # (TM, Fe) @ (Fe, He) -> +b1 -> ReLU -> (TM, He) @ (He, He) -> +b2
    x = x_ref[...].astype(compute_dtype)
    h = jnp.dot(x, w1_ref[...], preferred_element_type=jnp.float32)
    h = jnp.maximum(h + b1_ref[...], 0.0)                  # f32 VPU (v5e-safe)
    y = jnp.dot(h.astype(compute_dtype), w2_ref[...],
                preferred_element_type=jnp.float32) + b2_ref[...]
    # TODO(synk): dropout (p=0.2) omitted — eval-mode forward (identity). A
    # training-mode version needs pltpu.prng_seed + prng_random_bits in-kernel.
    o_ref[...] = y.astype(o_ref.dtype)


def feat_encoder_forward(x, params, *, row_tile=2048, compute_dtype=None):
    """x: (..., feat_dim) -> (..., hidden_dim).

    Weights in PyTorch layout: w1 (H, F), b1 (H,), w2 (H, H), b2 (H,).
    compute_dtype: None/f32 for exact PyTorch-f32 semantics, jnp.bfloat16 for
    the bf16-MXU path (f32 accumulation) recommended on v6e/v7x.
    """
    w1, b1, w2, b2 = params["w1"], params["b1"], params["w2"], params["b2"]
    H, F = w1.shape
    out_dtype = x.dtype
    if compute_dtype is None:
        compute_dtype = jnp.float32

    lead = x.shape[:-1]
    x2 = x.reshape(-1, F)
    M = x2.shape[0]

    # ---- lane-packing factor (lane-dense output without in-kernel relayout) --
    p = 1
    if H < 128 and 128 % H == 0:
        cand = 128 // H
        if M % cand == 0 and (M // cand) >= 8:
            p = cand
    Fe, He, Mr = p * F, p * H, M // p

    # One-time HBM-side layout fixes: (K, N) weights (block-diagonal if packed),
    # 2-D biases.  All tiny and resident in VMEM.
    w1_t = jnp.transpose(w1)                       # (F, H)
    w2_t = jnp.transpose(w2)                       # (H, H)
    if p > 1:
        eye = jnp.eye(p, dtype=w1_t.dtype)
        w1_t = jnp.kron(eye, w1_t)                 # (Fe, He) block-diagonal
        w2_t = jnp.kron(eye, w2_t)                 # (He, He) block-diagonal
        b1e = jnp.tile(b1, p).reshape(1, He)
        b2e = jnp.tile(b2, p).reshape(1, He)
    else:
        b1e = b1.reshape(1, He)
        b2e = b2.reshape(1, He)
    w1_t = w1_t.astype(compute_dtype)
    w2_t = w2_t.astype(compute_dtype)
    b1e = b1e.astype(jnp.float32)
    b2e = b2e.astype(jnp.float32)

    # Free (bit-identical) reshape of the input rows into packed rows.
    x2 = x2.reshape(Mr, Fe)

    # ---- row tiling (in packed-row units) ------------------------------------
    # Large tiles amortize per-step overhead; cap at ~half the rows (rounded to
    # the sublane multiple) so the 'parallel' grid has >= 2 steps for the two
    # v7x TensorCores whenever there is enough work.  No padding: grid = cdiv.
    tile = max(8, row_tile // p)
    tile = min(tile, max(8, _round_up(pl.cdiv(Mr, 2), 8)))
    grid = pl.cdiv(Mr, tile)

    kernel = functools.partial(_mlp_kernel, compute_dtype=compute_dtype)

    bytes_accessed = (
        x2.size * x2.dtype.itemsize
        + Mr * He * jnp.dtype(out_dtype).itemsize
        + w1_t.size * w1_t.dtype.itemsize
        + w2_t.size * w2_t.dtype.itemsize
        + (b1e.size + b2e.size) * 4
    )
    cost = pl.CostEstimate(flops=2 * M * H * (F + H),
                           transcendentals=0,
                           bytes_accessed=int(bytes_accessed))

    out = pl.pallas_call(
        kernel,
        out_shape=jax.ShapeDtypeStruct((Mr, He), out_dtype),
        grid_spec=pltpu.PrefetchScalarGridSpec(
            num_scalar_prefetch=0,
            grid=(grid,),
            in_specs=[
                pl.BlockSpec((tile, Fe), lambda i: (i, 0)),   # x rows (streamed)
                pl.BlockSpec((Fe, He), lambda i: (0, 0)),     # w1^T (resident)
                pl.BlockSpec((1, He), lambda i: (0, 0)),      # b1
                pl.BlockSpec((He, He), lambda i: (0, 0)),     # w2^T (resident)
                pl.BlockSpec((1, He), lambda i: (0, 0)),      # b2
            ],
            out_specs=pl.BlockSpec((tile, He), lambda i: (i, 0)),
        ),
        compiler_params=pltpu.CompilerParams(
            dimension_semantics=("parallel",),
        ),
        cost_estimate=cost,
    )(x2, w1_t, b1e, w2_t, b2e)

    # Bit-identical un-pack back to (..., H); no slicing, no extra HBM pass.
    return out.reshape(*lead, H)


def feat_encoder_ref(x, params):
    """Pure-JAX reference with PyTorch Linear semantics (y = x @ W^T + b)."""
    w1, b1, w2, b2 = params["w1"], params["b1"], params["w2"], params["b2"]
    h = jnp.maximum(x @ w1.T + b1, 0.0)
    return h @ w2.T + b2


def init_params(key, feat_dim, hidden_dim):
    k1, k2, k3, k4 = jax.random.split(key, 4)
    scale1 = 1.0 / (feat_dim ** 0.5)
    scale2 = 1.0 / (hidden_dim ** 0.5)
    return {
        "w1": (scale1 * jax.random.normal(k1, (hidden_dim, feat_dim))
               ).astype(jnp.float32),
        "b1": (0.01 * jax.random.normal(k2, (hidden_dim,))).astype(jnp.float32),
        "w2": (scale2 * jax.random.normal(k3, (hidden_dim, hidden_dim))
               ).astype(jnp.float32),
        "b2": (0.01 * jax.random.normal(k4, (hidden_dim,))).astype(jnp.float32),
    }


if __name__ == "__main__":
    FEAT, HID = 64, 32
    key = jax.random.PRNGKey(0)
    kx1, kx2, kp = jax.random.split(key, 3)
    params = init_params(kp, FEAT, HID)

    # Case 1: tiny input (batch=2, seq=8) -> 16 rows; exercises the plain
    # (un-packed) fallback path.
    x_small = jax.random.normal(kx1, (2, 8, FEAT), dtype=jnp.float32)
    out_s = jax.block_until_ready(feat_encoder_forward(x_small, params))
    ref_s = jax.block_until_ready(feat_encoder_ref(x_small, params))
    assert out_s.shape == (2, 8, HID)
    assert bool(jnp.all(jnp.isfinite(out_s)))
    assert bool(jnp.allclose(out_s, ref_s, atol=1e-4, rtol=1e-4)), (
        float(jnp.max(jnp.abs(out_s - ref_s))))

    # Case 2: (batch=4, seq=26) -> 104 rows; exercises the lane-dense packed
    # path (4 rows per 128-lane row), a 2-step 'parallel' grid, and a ragged
    # final block with no wrapper-side pad or slice.
    x_med = jax.random.normal(kx2, (4, 26, FEAT), dtype=jnp.float32)
    out_m = jax.block_until_ready(feat_encoder_forward(x_med, params))
    ref_m = jax.block_until_ready(feat_encoder_ref(x_med, params))
    assert out_m.shape == (4, 26, HID)
    assert bool(jnp.all(jnp.isfinite(out_m)))
    assert bool(jnp.allclose(out_m, ref_m, atol=1e-4, rtol=1e-4)), (
        float(jnp.max(jnp.abs(out_m - ref_m))))

    # Case 3: bf16 MXU-operand path (v6e/v7x recommendation); f32 accumulation,
    # tolerance bounded by bf16 input rounding.
    out_b = jax.block_until_ready(
        feat_encoder_forward(x_med, params, compute_dtype=jnp.bfloat16))
    assert out_b.shape == (4, 26, HID)
    assert bool(jnp.all(jnp.isfinite(out_b)))
    assert bool(jnp.allclose(out_b, ref_m, atol=1e-1, rtol=1e-1)), (
        float(jnp.max(jnp.abs(out_b - ref_m))))

    print("KERNEL_OK")
</pallas_src>

<mosaic_0001>
module attributes {stable_mosaic.version = 11 : i64} {
  func.func @_mlp_kernel(%arg0: i32, %arg1: memref<8x64xf32, #tpu.memory_space<vmem>>, %arg2: memref<64x32xf32, #tpu.memory_space<vmem>>, %arg3: memref<1x32xf32, #tpu.memory_space<vmem>>, %arg4: memref<32x32xf32, #tpu.memory_space<vmem>>, %arg5: memref<1x32xf32, #tpu.memory_space<vmem>>, %arg6: memref<8x32xf32, #tpu.memory_space<vmem>>) attributes {dimension_semantics = [#tpu.dimension_semantics<parallel>], iteration_bounds = array<i64: 2>, scalar_prefetch = 0 : i64, scratch_operands = 0 : i64, tpu.core_type = #tpu.core_type<tc>, window_params = [{transform_indices = @transform_0, window_bounds = array<i64: 8, 64>}, {pipeline_mode = #tpu.pipeline_mode<synchronous>, transform_indices = @transform_1, window_bounds = array<i64: 64, 32>}, {pipeline_mode = #tpu.pipeline_mode<synchronous>, transform_indices = @transform_2, window_bounds = array<i64: 1, 32>}, {pipeline_mode = #tpu.pipeline_mode<synchronous>, transform_indices = @transform_3, window_bounds = array<i64: 32, 32>}, {pipeline_mode = #tpu.pipeline_mode<synchronous>, transform_indices = @transform_4, window_bounds = array<i64: 1, 32>}, {transform_indices = @transform_5, window_bounds = array<i64: 8, 32>}]} {
    %c0 = arith.constant 0 : index
    %c0_0 = arith.constant 0 : index
    %0 = vector.load %arg1[%c0, %c0_0] : memref<8x64xf32, #tpu.memory_space<vmem>>, vector<8x64xf32>
    %c0_1 = arith.constant 0 : index
    %c0_2 = arith.constant 0 : index
    %1 = vector.load %arg2[%c0_1, %c0_2] : memref<64x32xf32, #tpu.memory_space<vmem>>, vector<64x32xf32>
    %cst = arith.constant dense<0.000000e+00> : vector<8x32xf32>
    %2 = tpu.matmul %0, %1, %cst {dimension_numbers = #tpu.dot_dimension_numbers<[1], [0], [0], [1], [0, 0, 1, 1], [], []>} : vector<8x64xf32>, vector<64x32xf32>, vector<8x32xf32> -> vector<8x32xf32>
    %c0_3 = arith.constant 0 : index
    %c0_4 = arith.constant 0 : index
    %3 = vector.load %arg3[%c0_3, %c0_4] : memref<1x32xf32, #tpu.memory_space<vmem>>, vector<1x32xf32>
    %4 = vector.broadcast %3 : vector<1x32xf32> to vector<8x32xf32>
    %5 = arith.addf %2, %4 : vector<8x32xf32>
    %cst_5 = arith.constant 0.000000e+00 : f32
    %6 = vector.broadcast %cst_5 : f32 to vector<8x32xf32>
    %7 = arith.maximumf %5, %6 : vector<8x32xf32>
    %c0_6 = arith.constant 0 : index
    %c0_7 = arith.constant 0 : index
    %8 = vector.load %arg4[%c0_6, %c0_7] : memref<32x32xf32, #tpu.memory_space<vmem>>, vector<32x32xf32>
    %cst_8 = arith.constant dense<0.000000e+00> : vector<8x32xf32>
    %9 = tpu.matmul %7, %8, %cst_8 {dimension_numbers = #tpu.dot_dimension_numbers<[1], [0], [0], [1], [0, 0, 1, 1], [], []>} : vector<8x32xf32>, vector<32x32xf32>, vector<8x32xf32> -> vector<8x32xf32>
    %c0_9 = arith.constant 0 : index
    %c0_10 = arith.constant 0 : index
    %10 = vector.load %arg5[%c0_9, %c0_10] : memref<1x32xf32, #tpu.memory_space<vmem>>, vector<1x32xf32>
    %11 = vector.broadcast %10 : vector<1x32xf32> to vector<8x32xf32>
    %12 = arith.addf %9, %11 : vector<8x32xf32>
    %c0_11 = arith.constant 0 : index
    %c0_12 = arith.constant 0 : index
    %13 = vector.load %arg6[%c0_11, %c0_12] : memref<8x32xf32, #tpu.memory_space<vmem>>, vector<8x32xf32>
    tpu.vector_store %arg6[%c0_11, %c0_12], %12 {strides = array<i32>} : memref<8x32xf32, #tpu.memory_space<vmem>>, vector<8x32xf32>,
    return
  }
  func.func @transform_0(%arg0: i32) -> (i32, i32) {
    %c0_i32 = arith.constant 0 : i32
    %c0_i32_0 = arith.constant 0 : i32
    return %arg0, %c0_i32 : i32, i32
  }
  func.func @transform_1(%arg0: i32) -> (i32, i32) {
    %c0_i32 = arith.constant 0 : i32
    %c0_i32_0 = arith.constant 0 : i32
    %c0_i32_1 = arith.constant 0 : i32
    return %c0_i32, %c0_i32_0 : i32, i32
  }
  func.func @transform_2(%arg0: i32) -> (i32, i32) {
    %c0_i32 = arith.constant 0 : i32
    %c0_i32_0 = arith.constant 0 : i32
    %c0_i32_1 = arith.constant 0 : i32
    return %c0_i32, %c0_i32_0 : i32, i32
  }
  func.func @transform_3(%arg0: i32) -> (i32, i32) {
    %c0_i32 = arith.constant 0 : i32
    %c0_i32_0 = arith.constant 0 : i32
    %c0_i32_1 = arith.constant 0 : i32
    return %c0_i32, %c0_i32_0 : i32, i32
  }
  func.func @transform_4(%arg0: i32) -> (i32, i32) {
    %c0_i32 = arith.constant 0 : i32
    %c0_i32_0 = arith.constant 0 : i32
    %c0_i32_1 = arith.constant 0 : i32
    return %c0_i32, %c0_i32_0 : i32, i32
  }
  func.func @transform_5(%arg0: i32) -> (i32, i32) {
    %c0_i32 = arith.constant 0 : i32
    %c0_i32_0 = arith.constant 0 : i32
    return %arg0, %c0_i32 : i32, i32
  }
}

</mosaic_0001>

<bundles_post_ra>
// kernel: tpu_custom_call.1
= control target key start
LH: loop header
LB: loop body
LE: loop exit
PB: predicated region body
PF: predicated region fallthrough
CT: control target
= control target key end

     0   :  { %10 = vsyncpa [#allocation3], 0  ;;  %s640_s0 = inlined_call_operand.vmem [shape: f32[16,64], index: 0, kind: input, shape index: {}]   ;;  %s641_s1 = inlined_call_operand.vmem [shape: f32[64,32], index: 1, kind: input, shape index: {}]   ;;  %s642_s2 = inlined_call_operand.vmem [shape: f32[1,32], index: 2, kind: input, shape index: {}]   ;;  %s643_s3 = inlined_call_operand.vmem [shape: f32[32,32], index: 3, kind: input, shape index: {}]   ;;  %s644_s4 = inlined_call_operand.vmem [shape: f32[1,32], index: 4, kind: input, shape index: {}]   ;;  %s645_s5 = inlined_call_operand.hbm [shape: f32[16,32], index: 5, kind: output, shape index: {}]  }
   0x1   :  { %12 = vsyncpa [#allocation3 + $0x1], 0  ;;  %s513_s18 = smov 0   ;;  %s515_s19 = smov 0  }
   0x2   :  { %s517_s20 = smov 0   ;;  %s519_s21 = smov 0  }
   0x3 LB: > { %s534_s22 = sadd.s32 4294967295, %s481_s21   ;;  %s366_s23 = sadd.s32 4294967294, %s481_s21   ;;  %s481_s21 = sphi %s519_s21, %s651_s21   ;;  %s477_s20 = sphi %s517_s20, %s650_s20   ;;  %s473_s19 = sphi %s515_s19, %s649_s19   ;;  %s469_s18 = sphi %s513_s18, %s648_s18  }
   0x4   : > { %s538_s24 = sadd.s32 1, %s481_s21   ;;  %s135_s25 = sadd.s32 1, %s477_s20 }
   0x5   : > { %s132_s26 = ssub.s32 %s481_s21, %s538_s24  ;;  %p145_p0 = scmp.ne.s32.totalorder %s477_s20, %s473_s19 }
   0x6   : > { %p133_p1 = scmp.eq.s32.totalorder %s132_s26, 0  ;;  %p146_p2 = scmp.eq.s32.totalorder %s534_s22, 1 }
   0x7   : > { %p151_p3 = scmp.ne.s32.totalorder %s473_s19, %s469_s18  ;;  %p152_p4 = scmp.eq.s32.totalorder %s366_s23, 1 }
   0x8   : > { %s549_s27 = scalar_select %p133_p1, %s477_s20, %s135_s25  }
   0x9   : > { %p551_p5 = por %p146_p2, %p145_p0  ;;  %p555_p6 = por %p152_p4, %p151_p3 }
   0xa   : > { %p369_p7 = scmp.ge.s32.totalorder %s481_s21, 1  ;;  %p189_p8 = scmp.lt.s32.totalorder %s481_s21, 3 }
   0xc   : > { %p190_p9 = pnand %p369_p7, %p189_p8 }
   0xd   : > { %p216_p10 = scmp.lt.s32.totalorder (!%p190_p9), %s534_s22, 1  ;;  %s213_s26 = sand.u32 (!%p190_p9), 1, %s473_s19  }
   0xe   : > { %193 = sbr.rel (%p190_p9) target bundleno = 296 (0x128), region = 40  ;;  %s370_s30 = sshll.u32 (!%p190_p9), %s213_s26, 3 }
   0xf   : > { %s375_s6 = sshll.u32 (!%p190_p9), %s534_s22, 3  ;;  %s215_s12 = scalar_lea.vmem (!%p190_p9), [#allocation2], %s370_s30 }
  0x10   : > { %s292_s15 = scalar_lea.sflag (!%p190_p9), [#allocation3], %s213_s26  ;;  %s439_s25 = scalar_lea.hbm (!%p190_p9), %s645_s5, 16 }
  0x13   : > { %v228_v0 = vld [vmem:[%s641_s1 + $0x38] sm:$0xff]  ;;  %v227_v1 = vld [vmem:[%s641_s1 + $0x30] sm:$0xff]  ;;  %v226_v2 = vld [vmem:[%s641_s1 + $0x28] sm:$0xff]  ;;  %s217_s13 = scalar_select %p216_p10, %s534_s22, 1  ;;  %vm233_vm0 = vcmask 523264   ;;  %vm266_vm1 = vcmask 261120  }
  0x14   : > { %245 = vmatpush.msra.mxu0 %v228_v0  ;;  %v261_v3 = vld [vmem:[%s643_s3 + $0x18] sm:$0xff]  ;;  %v225_v4 = vld [vmem:[%s641_s1 + $0x20] sm:$0xff]  ;;  %v223_v6 = vld [vmem:[%s641_s1 + $0x10] sm:$0xff] }
  0x15   : > { %282 = vmatpush.msra.mxu1 %v261_v3  ;;  %v224_v5 = vld [vmem:[%s641_s1 + $0x18] sm:$0xff]  ;;  %s371_s23 = sshll.u32 %s217_s13, 3  ;;  %v222_v7 = vld [vmem:[%s641_s1 + $0x8] sm:$0xff]  ;;  %v221_v8 = vld [vmem:[%s641_s1] sm:$0xff]  ;;  %s304_s13 = sshll.u32 %s215_s12, 4  ;;  %s305_s13 = int_to_ptr.vmem [resolvable:$true] %s304_s13 }
  0x16   : > { %246 = vmatpush.msra.mxu0 %v227_v1  ;;  %s219_s9 = scalar_lea.vmem %s640_s0, %s371_s23  ;;  %v260_v10 = vld [vmem:[%s643_s3 + $0x10] sm:$0xff]  ;;  %v259_v11 = vld [vmem:[%s643_s3 + $0x8] sm:$0xff]  ;;  %v258_v12 = vld [vmem:[%s643_s3] sm:$0xff] }
  0x17   : > { %v220_v9 = vld [vmem:[%s219_s9] sm:$0xff]  ;;  %283 = vmatpush.msra.mxu1 %v260_v10  ;;  %s302_s9 = scalar_lea.hbm %s645_s5, %s375_s6 }
  0x18   : > { %247 = vmatpush.msra.mxu0 %v226_v2  ;;  %v417_v13 = vld [vmem:[%s642_s2] ss:$0 sm:$0xff]  ;;  %s306_s14 = sshll.u32 %s302_s9, 4  ;;  %s307_s14 = int_to_ptr.hbm [resolvable:$true] %s306_s14 }
  0x19   : > { %284 = vmatpush.msra.mxu1 %v259_v11  ;;  %v418_v17 = vld [vmem:[%s644_s4] ss:$0 sm:$0xff]  ;;  %s433_s16 = sshra.s32 %s307_s14, 4  ;;  %s434_s16 = int_to_ptr.hbm [resolvable:$true] %s433_s16 }
  0x1a   : > { %248 = vmatpush.msra.mxu0 %v225_v4  ;;  %s435_s22 = scalar_lea.hbm %s434_s16, 8  ;;  %p440_p0 = scmp.lt.s32.totalorder %s434_s16, %s645_s5 }
  0x1b   : > { %285 = vmatpush.msra.mxu1 %v258_v12  ;;  %p436_p11 = scmp.ne.s32.totalorder %s434_s16, %s435_s22  ;;  %p441_p1 = scmp.lt.s32.totalorder %s439_s25, %s435_s22 }
  0x1c   : > { %249 = vmatpush.msra.mxu0 %v224_v5 }
  0x1d   : > { %p437_p12 = pnand %p436_p11, %p551_p5  ;;  %p442_p2 = por %p441_p1, %p440_p0 }
  0x1e   : > { %250 = vmatpush.msra.mxu0 %v223_v6 }
  0x1f   : > { %p438_p13 = pneg %p437_p12 }
  0x20   : > { %251 = vmatpush.msra.mxu0 %v222_v7 }
  0x21   : > { %p443_p3 = pnand %p442_p2, %p438_p13 }
  0x22   : > { %252 = vmatpush.msra.mxu0 %v221_v8 }
  0x23   : > { %372 = vmatmul.msk.f32.vlgmr.msra.gmra.mxu0 %vm233_vm0, %v220_v9 }
  0xa0   : > { %v254_v14 = vpop.f32.mrf.mxu0 }
  0xa1   : > { %v255_v15 = vadd.f32 %v417_v13, %v254_v14 }
  0xa3   : > { %v257_v16 = vmax.f32 %v255_v15, 0.0 }
  0xa5   : > { %373 = vmatmul.msk.f32.vlgmr.msra.gmra.mxu1 %vm266_vm1, %v257_v16 }
 0x122   : > { %v287_v18 = vpop.f32.mrf.mxu1 }
 0x123   : > { %v288_v19 = vadd.f32 %v418_v17, %v287_v18 }
 0x125   : > { %290 = vst.msk [vmem:[%s215_s12] sm:$0xff] %vm266_vm1, %v288_v19 }
 0x126   : > { %446 = shalt.err (!%p443_p3)
}
 0x127   : > { %378 = dma.vmem_to_hbm [thread:$0]  (%p551_p5), %s305_s13, 128, %s307_s14, %s292_s15  }
 0x128 PF: > { %p384_p4 = scmp.ge.s32.totalorder %s481_s21, 2  ;;  %s318_s26 = sand.u32 1, %s469_s18  }
 0x129   : > { %s319_s7 = scalar_lea.sflag [#allocation3], %s318_s26 }
 0x12a   : > { %p381_p7 = pnand %p384_p4, %p555_p6 }
 0x12c   : > { %p382_p8 = pneg %p381_p7 }
 0x12e   : > { %464 = dma.done.wait (%p382_p8), %s319_s7, 128  }
 0x12f   : > { %466 = vsyncadd (%p382_p8), %s319_s7, 4294967168  ;;  %p15_p9 = scmp.ge.s32.totalorder %s538_s24, 4   ;;  %s648_s18 = smov %s473_s19 }
 0x130   : > { %s649_s19 = smov %s477_s20  ;;  %s650_s20 = smov %s549_s27 }
 0x131   : > { %s651_s21 = smov %s538_s24  ;;  %17 = sbr.rel (!%p15_p9) target bundleno = 3 (0x3), region = 75 }
 0x136   :  { %325 = vsyncpa [#allocation3], 1 }
 0x137   :  { %327 = vsyncpa [#allocation3 + $0x1], 1 }

</bundles_post_ra>
